<compile_context>
chip_gen: v7x
topology: tpu7x:2x2x1
jax: 0.10.0
libtpu: 0.0.40
codegen_flags: <defaults>
</compile_context>

<pallas_src>
import math

import jax
import jax.numpy as jnp
from jax import lax
from jax.experimental import pallas as pl
from jax.experimental.pallas import tpu as pltpu


def _round_up(v, m):
    return (v + m - 1) // m * m


def _proj_kernel(p_ref, w_ref, b_ref, o_ref):
    # p_ref: (tm, Kp)  bf16 patch tile for this grid step
    # w_ref: (Kp, Ep)  bf16 weight (constant index_map -> fetched once, resident)
    # b_ref: (1, Ep)   fp32 bias
    # o_ref: (tm, Ep)  output tile (bf16 by default)
    acc = jnp.dot(p_ref[...], w_ref[...], preferred_element_type=jnp.float32)
    o_ref[...] = (acc + b_ref[...]).astype(o_ref.dtype)


def prepare_proj_params(weight, bias, compute_dtype=jnp.bfloat16):
    """One-time prep: Conv2d weight (E, C, ph, pw) -> padded (Kp, Ep) matmul
    weight in compute dtype, and fp32 bias padded to (1, Ep)."""
    E, C, ph, pw = weight.shape
    K = C * ph * pw
    Kp = _round_up(K, 128)
    Ep = _round_up(E, 128)
    w_mat = weight.reshape(E, K).T.astype(compute_dtype)       # (K, E)
    w_mat = jnp.pad(w_mat, ((0, Kp - K), (0, Ep - E)))         # (Kp, Ep)
    b_mat = jnp.pad(bias.astype(jnp.float32).reshape(1, E),
                    ((0, 0), (0, Ep - E)))                     # (1, Ep)
    return w_mat, b_mat


def patch_embed_overlap(x, w_mat, b_mat, embed_dim, patch_size, stride_size,
                        *, compute_dtype=jnp.bfloat16, out_dtype=None,
                        tm_target=512):
    """x: (B, C, H, W); w_mat/b_mat from prepare_proj_params -> (B, P, E)."""
    if out_dtype is None:
        out_dtype = compute_dtype
    B, C, H, W = x.shape
    ph, pw = patch_size
    sh, sw = stride_size
    assert H >= ph and W >= pw, "input smaller than one patch"
    # PyTorch Conv2d floors the number of windows; remainders are dropped.
    num_y = (H - ph) // sh + 1
    num_x = (W - pw) // sw + 1
    P = num_y * num_x
    K = C * ph * pw
    Kp, Ep = w_mat.shape
    assert Kp == _round_up(K, 128) and Ep >= embed_dim

    # im2col: one fused patch-extraction conv.  Output feature order is
    # (channel, ph, pw) -- the same flattening as the Conv2d OIHW weight --
    # emitted channels-last so no transpose is needed.  The bf16 cast sits
    # directly on the conv input so XLA fuses it (no separate copy of x).
    patches = lax.conv_general_dilated_patches(
        x.astype(compute_dtype), filter_shape=(ph, pw),
        window_strides=(sh, sw), padding="VALID",
        dimension_numbers=("NCHW", "OIHW", "NHWC"))            # (B, ny, nx, K)
    M = B * P
    patches = patches.reshape(M, K)

    # K-pad only when K is not already a 128-multiple (columns must be zeroed
    # so the contraction against the zero weight rows stays exact).  No M pad:
    # Pallas handles the ragged last M block.
    if Kp != K:
        patches = jnp.pad(patches, ((0, 0), (0, Kp - K)))

    # MXU/sublane-aligned M tile: multiple of 256 (or tm_target if smaller,
    # e.g. 128 on v5e), >= multiple grid steps for realistic M (pipelining +
    # 2-TC sharding of the "parallel" axis), and never grossly larger than M.
    tm = min(tm_target, max(256, _round_up(pl.cdiv(M, 4), 256)))
    tm = min(tm, _round_up(M, 16))        # tiny-M case: one small aligned tile
    tm = max(tm, 8)
    grid_m = pl.cdiv(M, tm)

    flops = 2 * M * K * embed_dim
    bytes_accessed = (patches.size * patches.dtype.itemsize
                      + w_mat.size * w_mat.dtype.itemsize
                      + b_mat.size * b_mat.dtype.itemsize
                      + M * Ep * jnp.dtype(out_dtype).itemsize)

    def _run(single_buffer_consts):
        # Constant-index weight/bias never change block -> a single VMEM
        # buffer is enough (saves a weight-sized buffer; matters on v7x's
        # 64 MiB VMEM).  Fall back to default double-buffering if the running
        # JAX does not accept pipeline_mode / Buffered(1).
        const_mode = ({"pipeline_mode": pl.Buffered(1)}
                      if single_buffer_consts else {})
        grid_spec = pltpu.PrefetchScalarGridSpec(
            num_scalar_prefetch=0,
            grid=(grid_m,),
            in_specs=[
                pl.BlockSpec((tm, Kp), lambda i: (i, 0)),
                pl.BlockSpec((Kp, Ep), lambda i: (0, 0), **const_mode),
                pl.BlockSpec((1, Ep), lambda i: (0, 0), **const_mode),
            ],
            out_specs=pl.BlockSpec((tm, Ep), lambda i: (i, 0)),
        )
        return pl.pallas_call(
            _proj_kernel,
            out_shape=jax.ShapeDtypeStruct((M, Ep), out_dtype),
            grid_spec=grid_spec,
            compiler_params=pltpu.CompilerParams(
                dimension_semantics=("parallel",),
                # Let XLA fuse the cast/reshape(/pad) chain producing the
                # patch matrix into the kernel's input fetch when it can.
                allow_input_fusion=[True, False, False],
            ),
            cost_estimate=pl.CostEstimate(
                flops=flops, transcendentals=0,
                bytes_accessed=bytes_accessed),
        )(patches, w_mat, b_mat)

    try:
        out = _run(True)
    except Exception:   # older/newer JAX without Buffered(1) support
        out = _run(False)

    # Only the (cheap, often no-op) E-pad slice remains; no M slice copy.
    if Ep != embed_dim:
        out = out[:, :embed_dim]
    return out.reshape(B, P, embed_dim)


if __name__ == "__main__":
    # Small shapes consistent with the module (overlapping: stride < patch).
    B, C, H, W = 2, 4, 16, 16
    patch_size = (4, 4)
    stride_size = (3, 3)
    embed_dim = 32

    num_y = (H - patch_size[0]) // stride_size[0] + 1
    num_x = (W - patch_size[1]) // stride_size[1] + 1
    print('using stride: {}, and patch number is num_y{} * num_x{}'.format(
        stride_size, num_y, num_x))

    key = jax.random.PRNGKey(0)
    kx, kw, kb = jax.random.split(key, 3)

    x = jax.random.normal(kx, (B, C, H, W), dtype=jnp.float32)

    # Deterministic init mirroring the module: weight ~ N(0, sqrt(2/n)),
    # n = kh*kw*out_channels; Conv2d-style small uniform bias.
    n = patch_size[0] * patch_size[1] * embed_dim
    weight = jax.random.normal(
        kw, (embed_dim, C, patch_size[0], patch_size[1]),
        dtype=jnp.float32) * math.sqrt(2.0 / n)
    fan_in = C * patch_size[0] * patch_size[1]
    bound = 1.0 / math.sqrt(fan_in)
    bias = jax.random.uniform(kb, (embed_dim,), dtype=jnp.float32,
                              minval=-bound, maxval=bound)

    # One-time weight prep (hoisted out of the forward).
    w_mat, b_mat = prepare_proj_params(weight, bias)

    out = patch_embed_overlap(x, w_mat, b_mat, embed_dim,
                              patch_size, stride_size)
    out = jax.block_until_ready(out)

    assert out.shape == (B, num_y * num_x, embed_dim)
    assert out.dtype == jnp.bfloat16
    out_f32 = out.astype(jnp.float32)

    # Reference 1 (also a canary for the patch feature ordering): fp32 conv on
    # bf16-rounded operands (matches the MXU bf16 matmul with fp32 accum),
    # then flatten(2).transpose(1, 2).  Tolerance covers the bf16 output
    # rounding of the kernel store.
    x_r = x.astype(jnp.bfloat16).astype(jnp.float32)
    w_r = weight.astype(jnp.bfloat16).astype(jnp.float32)
    ref = lax.conv_general_dilated(
        x_r, w_r, window_strides=stride_size, padding="VALID",
        dimension_numbers=("NCHW", "OIHW", "NCHW"))
    ref = ref + bias[None, :, None, None]
    ref = ref.reshape(B, embed_dim, num_y * num_x).transpose(0, 2, 1)

    # Reference 2: full fp32 conv (loose check; only operand/output bf16
    # rounding separates the two).
    ref32 = lax.conv_general_dilated(
        x, weight, window_strides=stride_size, padding="VALID",
        dimension_numbers=("NCHW", "OIHW", "NCHW"))
    ref32 = ref32 + bias[None, :, None, None]
    ref32 = ref32.reshape(B, embed_dim, num_y * num_x).transpose(0, 2, 1)

    assert jnp.allclose(out_f32, ref, atol=2e-2, rtol=2e-2)
    assert jnp.allclose(out_f32, ref32, atol=5e-2, rtol=5e-2)
    print("KERNEL_OK")
</pallas_src>

<mosaic_0001>
module attributes {stable_mosaic.version = 11 : i64} {
  func.func @_proj_kernel(%arg0: i32, %arg1: memref<64x128xbf16, #tpu.memory_space<vmem>>, %arg2: memref<128x128xbf16, #tpu.memory_space<vmem>>, %arg3: memref<1x128xf32, #tpu.memory_space<vmem>>, %arg4: memref<64x128xbf16, #tpu.memory_space<vmem>>) attributes {dimension_semantics = [#tpu.dimension_semantics<parallel>], iteration_bounds = array<i64: 1>, scalar_prefetch = 0 : i64, scratch_operands = 0 : i64, tpu.core_type = #tpu.core_type<tc>, window_params = [{transform_indices = @transform_0, window_bounds = array<i64: 64, 128>}, {pipeline_mode = #tpu.pipeline_mode<synchronous>, transform_indices = @transform_1, window_bounds = array<i64: 128, 128>}, {pipeline_mode = #tpu.pipeline_mode<synchronous>, transform_indices = @transform_2, window_bounds = array<i64: 1, 128>}, {transform_indices = @transform_3, window_bounds = array<i64: 64, 128>}]} {
    %c0 = arith.constant 0 : index
    %c0_0 = arith.constant 0 : index
    %0 = vector.load %arg1[%c0, %c0_0] : memref<64x128xbf16, #tpu.memory_space<vmem>>, vector<64x128xbf16>
    %c0_1 = arith.constant 0 : index
    %c0_2 = arith.constant 0 : index
    %1 = vector.load %arg2[%c0_1, %c0_2] : memref<128x128xbf16, #tpu.memory_space<vmem>>, vector<128x128xbf16>
    %cst = arith.constant dense<0.000000e+00> : vector<64x128xf32>
    %2 = tpu.matmul %0, %1, %cst {dimension_numbers = #tpu.dot_dimension_numbers<[1], [0], [0], [1], [0, 0, 1, 1], [], []>} : vector<64x128xbf16>, vector<128x128xbf16>, vector<64x128xf32> -> vector<64x128xf32>
    %c0_3 = arith.constant 0 : index
    %c0_4 = arith.constant 0 : index
    %3 = vector.load %arg3[%c0_3, %c0_4] : memref<1x128xf32, #tpu.memory_space<vmem>>, vector<1x128xf32>
    %4 = vector.broadcast %3 : vector<1x128xf32> to vector<64x128xf32>
    %5 = arith.addf %2, %4 : vector<64x128xf32>
    %6 = arith.truncf %5 : vector<64x128xf32> to vector<64x128xbf16>
    %c0_5 = arith.constant 0 : index
    %c0_6 = arith.constant 0 : index
    %7 = vector.load %arg4[%c0_5, %c0_6] : memref<64x128xbf16, #tpu.memory_space<vmem>>, vector<64x128xbf16>
    tpu.vector_store %arg4[%c0_5, %c0_6], %6 {strides = array<i32>} : memref<64x128xbf16, #tpu.memory_space<vmem>>, vector<64x128xbf16>,
    return
  }
  func.func @transform_0(%arg0: i32) -> (i32, i32) {
    %c0_i32 = arith.constant 0 : i32
    %c0_i32_0 = arith.constant 0 : i32
    return %arg0, %c0_i32 : i32, i32
  }
  func.func @transform_1(%arg0: i32) -> (i32, i32) {
    %c0_i32 = arith.constant 0 : i32
    %c0_i32_0 = arith.constant 0 : i32
    %c0_i32_1 = arith.constant 0 : i32
    return %c0_i32, %c0_i32_0 : i32, i32
  }
  func.func @transform_2(%arg0: i32) -> (i32, i32) {
    %c0_i32 = arith.constant 0 : i32
    %c0_i32_0 = arith.constant 0 : i32
    %c0_i32_1 = arith.constant 0 : i32
    return %c0_i32, %c0_i32_0 : i32, i32
  }
  func.func @transform_3(%arg0: i32) -> (i32, i32) {
    %c0_i32 = arith.constant 0 : i32
    %c0_i32_0 = arith.constant 0 : i32
    return %arg0, %c0_i32 : i32, i32
  }
}

module attributes {stable_mosaic.version = 11 : i64} {
  func.func @_proj_kernel(%arg0: i32, %arg1: memref<64x128xbf16, #tpu.memory_space<vmem>>, %arg2: memref<128x128xbf16, #tpu.memory_space<vmem>>, %arg3: memref<1x128xf32, #tpu.memory_space<vmem>>, %arg4: memref<64x128xbf16, #tpu.memory_space<vmem>>) attributes {dimension_semantics = [#tpu.dimension_semantics<parallel>], iteration_bounds = array<i64: 1>, scalar_prefetch = 0 : i64, scratch_operands = 0 : i64, tpu.core_type = #tpu.core_type<tc>, window_params = [{transform_indices = @transform_0, window_bounds = array<i64: 64, 128>}, {pipeline_mode = #tpu.pipeline_mode<synchronous>, transform_indices = @transform_1, window_bounds = array<i64: 128, 128>}, {pipeline_mode = #tpu.pipeline_mode<synchronous>, transform_indices = @transform_2, window_bounds = array<i64: 1, 128>}, {transform_indices = @transform_3, window_bounds = array<i64: 64, 128>}]} {
    %c0 = arith.constant 0 : index
    %c0_0 = arith.constant 0 : index
    %0 = vector.load %arg1[%c0, %c0_0] : memref<64x128xbf16, #tpu.memory_space<vmem>>, vector<64x128xbf16>
    %c0_1 = arith.constant 0 : index
    %c0_2 = arith.constant 0 : index
    %1 = vector.load %arg2[%c0_1, %c0_2] : memref<128x128xbf16, #tpu.memory_space<vmem>>, vector<128x128xbf16>
    %cst = arith.constant dense<0.000000e+00> : vector<64x128xf32>
    %2 = tpu.matmul %0, %1, %cst {dimension_numbers = #tpu.dot_dimension_numbers<[1], [0], [0], [1], [0, 0, 1, 1], [], []>} : vector<64x128xbf16>, vector<128x128xbf16>, vector<64x128xf32> -> vector<64x128xf32>
    %c0_3 = arith.constant 0 : index
    %c0_4 = arith.constant 0 : index
    %3 = vector.load %arg3[%c0_3, %c0_4] : memref<1x128xf32, #tpu.memory_space<vmem>>, vector<1x128xf32>
    %4 = vector.broadcast %3 : vector<1x128xf32> to vector<64x128xf32>
    %5 = arith.addf %2, %4 : vector<64x128xf32>
    %6 = arith.truncf %5 : vector<64x128xf32> to vector<64x128xbf16>
    %c0_5 = arith.constant 0 : index
    %c0_6 = arith.constant 0 : index
    %7 = vector.load %arg4[%c0_5, %c0_6] : memref<64x128xbf16, #tpu.memory_space<vmem>>, vector<64x128xbf16>
    tpu.vector_store %arg4[%c0_5, %c0_6], %6 {strides = array<i32>} : memref<64x128xbf16, #tpu.memory_space<vmem>>, vector<64x128xbf16>,
    return
  }
  func.func @transform_0(%arg0: i32) -> (i32, i32) {
    %c0_i32 = arith.constant 0 : i32
    %c0_i32_0 = arith.constant 0 : i32
    return %arg0, %c0_i32 : i32, i32
  }
  func.func @transform_1(%arg0: i32) -> (i32, i32) {
    %c0_i32 = arith.constant 0 : i32
    %c0_i32_0 = arith.constant 0 : i32
    %c0_i32_1 = arith.constant 0 : i32
    return %c0_i32, %c0_i32_0 : i32, i32
  }
  func.func @transform_2(%arg0: i32) -> (i32, i32) {
    %c0_i32 = arith.constant 0 : i32
    %c0_i32_0 = arith.constant 0 : i32
    %c0_i32_1 = arith.constant 0 : i32
    return %c0_i32, %c0_i32_0 : i32, i32
  }
  func.func @transform_3(%arg0: i32) -> (i32, i32) {
    %c0_i32 = arith.constant 0 : i32
    %c0_i32_0 = arith.constant 0 : i32
    return %arg0, %c0_i32 : i32, i32
  }
}

</mosaic_0001>

<bundles_post_ra>
// kernel: tpu_custom_call.1
= control target key start
LH: loop header
LB: loop body
LE: loop exit
PB: predicated region body
PF: predicated region fallthrough
CT: control target
= control target key end

     0   :  { %8 = vsyncpa [#allocation3], 0  ;;  %s536_s0 = inlined_call_operand.hbm [shape: bf16[50,128], index: 0, kind: input, shape index: {}]   ;;  %s537_s1 = inlined_call_operand.hbm [shape: bf16[128,128], index: 1, kind: input, shape index: {}]   ;;  %s538_s2 = inlined_call_operand.vmem [shape: f32[1,128], index: 2, kind: input, shape index: {}]   ;;  %s539_s3 = inlined_call_operand.hbm [shape: bf16[50,128], index: 3, kind: output, shape index: {}]  }
   0x1   :  { %9 = vsyncpa [#allocation6], 0 }
   0x2   :  { %10 = vsyncpa [#allocation4], 0 }
   0x3   :  { %15 = vsyncadd [#allocation3], 64  ;;  %s463_s12 = smov [#allocation2]   ;;  %s391_s16 = scalar_lea.hbm %s536_s0, 448 }
   0x4   :  { %s16_s13 = sshll.u32 %s463_s12, 4  ;;  %p392_p0 = scmp.ne.s32.totalorder %s536_s0, %s391_s16  ;;  %s17_s13 = int_to_ptr.vmem [resolvable:$true] %s16_s13 }
   0x5   :  { %p395_p1 = scmp.lt.u32.totalorder %s391_s16, %s536_s0 }
   0x7   :  { %p397_p2 = pnand %p395_p1, %p392_p0 }
   0x9   :  { %400 = shalt.err (!%p397_p2)
}
   0xa   :  { %s401_s21 = scalar_lea.vmem %s17_s13, 448  ;;  %s405_s22 = scalar_lea.vmem %s17_s13, 512 }
   0xb   :  { %p402_p3 = scmp.ne.s32.totalorder %s17_s13, %s401_s21  ;;  %p406_p4 = scmp.lt.s32.totalorder %s17_s13, %s17_s13 }
   0xc   :  { %p407_p5 = scmp.lt.s32.totalorder %s405_s22, %s401_s21 }
   0xe   :  { %p408_p6 = por %p407_p5, %p406_p4 }
  0x10   :  { %p409_p7 = pnand %p408_p6, %p402_p3 }
  0x12   :  { %412 = shalt.err (!%p409_p7)
}
  0x13   :  { %s464_s23 = smov 64   ;;  %s465_s24 = smov 4  }
  0x14   :  { %22 = dma.hbm_to_vmem [thread:$0]  %s536_s0, 448, %s17_s13, [#allocation3], %s464_s23, %s464_s23, %s465_s24  }
  0x15   :  { %s466_s27 = smov [#allocation5]   ;;  %s413_s4 = scalar_lea.hbm %s537_s1, 1024 }
  0x16   :  { %s28_s28 = sshll.u32 %s466_s27, 4  ;;  %p414_p8 = scmp.ne.s32.totalorder %s537_s1, %s413_s4  ;;  %s29_s28 = int_to_ptr.vmem [resolvable:$true] %s28_s28 }
  0x17   :  { %p417_p9 = scmp.lt.u32.totalorder %s413_s4, %s537_s1 }
  0x19   :  { %p419_p10 = pnand %p417_p9, %p414_p8 }
  0x1b   :  { %422 = shalt.err (!%p419_p10)
}
  0x1c   :  { %s423_s9 = scalar_lea.vmem %s29_s28, 1024  ;;  %p428_p12 = scmp.lt.s32.totalorder %s29_s28, %s29_s28 }
  0x1d   :  { %p424_p11 = scmp.ne.s32.totalorder %s29_s28, %s423_s9  ;;  %p429_p13 = scmp.lt.s32.totalorder %s423_s9, %s423_s9 }
  0x1f   :  { %p430_p0 = por %p429_p13, %p428_p12 }
  0x21   :  { %p431_p1 = pnand %p430_p0, %p424_p11 }
  0x23   :  { %434 = shalt.err (!%p431_p1)
}
  0x24   :  { %34 = dma.hbm_to_vmem [thread:$0]  %s537_s1, 1024, %s29_s28, [#allocation6], %s464_s23, %s464_s23, %s465_s24  }
  0x25   :  { %457 = dma.done.wait [#allocation3], 512  }
  0x26   :  { %458 = vsyncadd [#allocation3], 4294966784 }
  0x27   :  { %459 = dma.done.wait [#allocation6], 1024  }
  0x28   :  { %460 = vsyncadd [#allocation6], 4294966272  ;;  %v379_v0 = vld [vmem:[#allocation5] sm:$0xff]   ;;  %v380_v1 = vld [vmem:[#allocation5 + $0x8] sm:$0xff]  }
  0x29   :  { %334 = vmatprep.subr.bf16.mxu0 %v379_v0  ;;  %358 = vmatprep.subr.bf16.mxu1 %v379_v0  ;;  %v381_v2 = vld [vmem:[#allocation5 + $0x10] sm:$0xff]   ;;  %v382_v3 = vld [vmem:[#allocation5 + $0x18] sm:$0xff]   ;;  %v387_v4 = vld [vmem:[#allocation2] sm:$0xff]  }
  0x2a   :  { %335 = vmatpush3.bf16.msra.mxu0 %v379_v0  ;;  %366 = vmatpush3.bf16.msra.mxu1 %v379_v0  ;;  %v388_v5 = vld [vmem:[#allocation2 + $0x10] sm:$0xff]   ;;  %v383_v6 = vld [vmem:[#allocation5 + $0x20] sm:$0xff]   ;;  %v384_v7 = vld [vmem:[#allocation5 + $0x28] sm:$0xff]  }
  0x2b   :  { %336 = vmatprep.subr.bf16.mxu0 %v380_v1  ;;  %359 = vmatprep.subr.bf16.mxu1 %v380_v1  ;;  %v385_v8 = vld [vmem:[#allocation5 + $0x30] sm:$0xff]   ;;  %v386_v9 = vld [vmem:[#allocation5 + $0x38] sm:$0xff]   ;;  %v389_v10 = vld [vmem:[#allocation2 + $0x8] sm:$0xff]  }
  0x2c   :  { %350 = vmatprep.mubr.bf16.mxu0 %v387_v4  ;;  %354 = vmatprep.mubr.bf16.mxu1 %v388_v5  ;;  %v390_v11 = vld [vmem:[#allocation2 + $0x18] sm:$0xff]   ;;  %v270_v13 = vld [vmem:[%s538_s2] ss:$0 sm:$0xff] }
  0x2e   :  { %337 = vmatpush3.bf16.msra.mxu0 %v380_v1  ;;  %367 = vmatpush3.bf16.msra.mxu1 %v380_v1 }
  0x2f   :  { %338 = vmatprep.subr.bf16.mxu0 %v381_v2  ;;  %360 = vmatprep.subr.bf16.mxu1 %v381_v2 }
  0x32   :  { %339 = vmatpush3.bf16.msra.mxu0 %v381_v2  ;;  %368 = vmatpush3.bf16.msra.mxu1 %v381_v2 }
  0x33   :  { %340 = vmatprep.subr.bf16.mxu0 %v382_v3  ;;  %361 = vmatprep.subr.bf16.mxu1 %v382_v3 }
  0x36   :  { %341 = vmatpush3.bf16.msra.mxu0 %v382_v3  ;;  %369 = vmatpush3.bf16.msra.mxu1 %v382_v3 }
  0x37   :  { %342 = vmatprep.subr.bf16.mxu0 %v383_v6  ;;  %362 = vmatprep.subr.bf16.mxu1 %v383_v6 }
  0x3a   :  { %343 = vmatpush3.bf16.msra.mxu0 %v383_v6  ;;  %370 = vmatpush3.bf16.msra.mxu1 %v383_v6 }
  0x3b   :  { %344 = vmatprep.subr.bf16.mxu0 %v384_v7  ;;  %363 = vmatprep.subr.bf16.mxu1 %v384_v7 }
  0x3e   :  { %345 = vmatpush3.bf16.msra.mxu0 %v384_v7  ;;  %371 = vmatpush3.bf16.msra.mxu1 %v384_v7 }
  0x3f   :  { %346 = vmatprep.subr.bf16.mxu0 %v385_v8  ;;  %364 = vmatprep.subr.bf16.mxu1 %v385_v8 }
  0x42   :  { %347 = vmatpush3.bf16.msra.mxu0 %v385_v8  ;;  %372 = vmatpush3.bf16.msra.mxu1 %v385_v8 }
  0x43   :  { %348 = vmatprep.subr.bf16.mxu0 %v386_v9  ;;  %365 = vmatprep.subr.bf16.mxu1 %v386_v9 }
  0x46   :  { %349 = vmatpush3.bf16.msra.mxu0 %v386_v9  ;;  %373 = vmatpush3.bf16.msra.mxu1 %v386_v9 }
  0x49   :  { %351 = vmatmul.mubr.bf16.vlgmr.msra.gmra.mrb[0].mxu0 %v389_v10  ;;  %355 = vmatmul.mubr.bf16.vlgmr.msra.gmra.mrb[0].mxu1 %v390_v11 }
 0x11c   :  { %v352_v12 = vpop.f32.mrb[0].mxu0  ;;  %v356_v14 = vpop.f32.mrb[0].mxu1 }
 0x11d   :  { %v181_v15 = vpop.f32.mrb[1].mxu0  ;;  %v197_v16 = vpop.f32.mrb[1].mxu1  ;;  %v190_v19 = vadd.f32 %v352_v12, %v270_v13  ;;  %v206_v20 = vadd.f32 %v356_v14, %v270_v13 }
 0x11e   :  { %v353_v17 = vpop.f32.mrb[2].mxu0  ;;  %v357_v18 = vpop.f32.mrb[2].mxu1  ;;  %v182_v25 = vadd.f32 %v270_v13, %v181_v15  ;;  %v198_v26 = vadd.f32 %v270_v13, %v197_v16 }
 0x11f   :  { %v193_v21 = vadd.f32 %v353_v17, %v270_v13  ;;  %v209_v22 = vadd.f32 %v357_v18, %v270_v13  ;;  %v184_v23 = vpop.f32.mrb[3].mxu0  ;;  %v200_v24 = vpop.f32.mrb[3].mxu1 }
 0x120   :  { %v185_v27 = vadd.f32 %v270_v13, %v184_v23  ;;  %v201_v28 = vadd.f32 %v270_v13, %v200_v24 }
 0x121   :  { %v307_v29 = vpack.c.bf16 %v193_v21, %v190_v19  ;;  %v317_v30 = vpack.c.bf16 %v209_v22, %v206_v20 }
 0x122   :  { %v302_v31 = vpack.c.bf16 %v185_v27, %v182_v25  ;;  %v312_v32 = vpack.c.bf16 %v201_v28, %v198_v26 }
 0x123   :  { %319 = vst [vmem:[#allocation7 + $0x8] sm:$0xff] %v307_v29   ;;  %321 = vst [vmem:[#allocation7 + $0x18] sm:$0xff] %v317_v30  }
 0x124   :  { %303 = vst [vmem:[#allocation7] sm:$0xff] %v302_v31   ;;  %320 = vst [vmem:[#allocation7 + $0x10] sm:$0xff] %v312_v32  }
 0x125   :  { %256 = vsyncadd [#allocation4], 64  ;;  %s467_s2 = smov [#allocation7]  }
 0x126   :  { %s257_s12 = sshll.u32 %s467_s2, 4  ;;  %s258_s12 = int_to_ptr.vmem [resolvable:$true] %s257_s12 }
 0x127   :  { %s435_s13 = scalar_lea.vmem %s258_s12, 448  ;;  %s439_s14 = scalar_lea.vmem %s258_s12, 512 }
 0x128   :  { %p436_p2 = scmp.ne.s32.totalorder %s258_s12, %s435_s13  ;;  %p440_p3 = scmp.lt.s32.totalorder %s258_s12, %s258_s12 }
 0x129   :  { %p441_p4 = scmp.lt.s32.totalorder %s439_s14, %s435_s13 }
 0x12b   :  { %p442_p5 = por %p441_p4, %p440_p3 }
 0x12d   :  { %p443_p6 = pnand %p442_p5, %p436_p2 }
 0x12f   :  { %446 = shalt.err (!%p443_p6)
}
 0x130   :  { %s447_s17 = scalar_lea.hbm %s539_s3, 448 }
 0x131   :  { %p448_p7 = scmp.ne.s32.totalorder %s539_s3, %s447_s17  ;;  %p451_p8 = scmp.lt.u32.totalorder %s447_s17, %s539_s3 }
 0x133   :  { %p453_p9 = pnand %p451_p8, %p448_p7 }
 0x135   :  { %456 = shalt.err (!%p453_p9)
}
 0x136   :  { %263 = dma.vmem_to_hbm [thread:$0]  %s258_s12, 448, %s539_s3, [#allocation4], %s464_s23, %s464_s23, %s465_s24  }
 0x137   :  { %461 = dma.done.wait [#allocation4], 512  }
 0x138   :  { %462 = vsyncadd [#allocation4], 4294966784 }
 0x139   :  { %267 = vsyncpa [#allocation3], 1 }
 0x13a   :  { %268 = vsyncpa [#allocation6], 1 }
 0x13b   :  { %269 = vsyncpa [#allocation4], 1 }

// kernel: tpu_custom_call.1
= control target key start
LH: loop header
LB: loop body
LE: loop exit
PB: predicated region body
PF: predicated region fallthrough
CT: control target
= control target key end

     0   :  { %8 = vsyncpa [#allocation3], 0  ;;  %s536_s0 = inlined_call_operand.hbm [shape: bf16[50,128], index: 0, kind: input, shape index: {}]   ;;  %s537_s1 = inlined_call_operand.hbm [shape: bf16[128,128], index: 1, kind: input, shape index: {}]   ;;  %s538_s2 = inlined_call_operand.vmem [shape: f32[1,128], index: 2, kind: input, shape index: {}]   ;;  %s539_s3 = inlined_call_operand.hbm [shape: bf16[50,128], index: 3, kind: output, shape index: {}]  }
   0x1   :  { %9 = vsyncpa [#allocation6], 0 }
   0x2   :  { %10 = vsyncpa [#allocation4], 0 }
   0x3   :  { %15 = vsyncadd [#allocation3], 64  ;;  %s463_s12 = smov [#allocation2]   ;;  %s391_s16 = scalar_lea.hbm %s536_s0, 448 }
   0x4   :  { %s16_s13 = sshll.u32 %s463_s12, 4  ;;  %p392_p0 = scmp.ne.s32.totalorder %s536_s0, %s391_s16  ;;  %s17_s13 = int_to_ptr.vmem [resolvable:$true] %s16_s13 }
   0x5   :  { %p395_p1 = scmp.lt.u32.totalorder %s391_s16, %s536_s0 }
   0x7   :  { %p397_p2 = pnand %p395_p1, %p392_p0 }
   0x9   :  { %400 = shalt.err (!%p397_p2)
}
   0xa   :  { %s401_s21 = scalar_lea.vmem %s17_s13, 448  ;;  %s405_s22 = scalar_lea.vmem %s17_s13, 512 }
   0xb   :  { %p402_p3 = scmp.ne.s32.totalorder %s17_s13, %s401_s21  ;;  %p406_p4 = scmp.lt.s32.totalorder %s17_s13, %s17_s13 }
   0xc   :  { %p407_p5 = scmp.lt.s32.totalorder %s405_s22, %s401_s21 }
   0xe   :  { %p408_p6 = por %p407_p5, %p406_p4 }
  0x10   :  { %p409_p7 = pnand %p408_p6, %p402_p3 }
  0x12   :  { %412 = shalt.err (!%p409_p7)
}
  0x13   :  { %s464_s23 = smov 64   ;;  %s465_s24 = smov 4  }
  0x14   :  { %22 = dma.hbm_to_vmem [thread:$0]  %s536_s0, 448, %s17_s13, [#allocation3], %s464_s23, %s464_s23, %s465_s24  }
  0x15   :  { %s466_s27 = smov [#allocation5]   ;;  %s413_s4 = scalar_lea.hbm %s537_s1, 1024 }
  0x16   :  { %s28_s28 = sshll.u32 %s466_s27, 4  ;;  %p414_p8 = scmp.ne.s32.totalorder %s537_s1, %s413_s4  ;;  %s29_s28 = int_to_ptr.vmem [resolvable:$true] %s28_s28 }
  0x17   :  { %p417_p9 = scmp.lt.u32.totalorder %s413_s4, %s537_s1 }
  0x19   :  { %p419_p10 = pnand %p417_p9, %p414_p8 }
  0x1b   :  { %422 = shalt.err (!%p419_p10)
}
  0x1c   :  { %s423_s9 = scalar_lea.vmem %s29_s28, 1024  ;;  %p428_p12 = scmp.lt.s32.totalorder %s29_s28, %s29_s28 }
  0x1d   :  { %p424_p11 = scmp.ne.s32.totalorder %s29_s28, %s423_s9  ;;  %p429_p13 = scmp.lt.s32.totalorder %s423_s9, %s423_s9 }
  0x1f   :  { %p430_p0 = por %p429_p13, %p428_p12 }
  0x21   :  { %p431_p1 = pnand %p430_p0, %p424_p11 }
  0x23   :  { %434 = shalt.err (!%p431_p1)
}
  0x24   :  { %34 = dma.hbm_to_vmem [thread:$0]  %s537_s1, 1024, %s29_s28, [#allocation6], %s464_s23, %s464_s23, %s465_s24  }
  0x25   :  { %457 = dma.done.wait [#allocation3], 512  }
  0x26   :  { %458 = vsyncadd [#allocation3], 4294966784 }
  0x27   :  { %459 = dma.done.wait [#allocation6], 1024  }
  0x28   :  { %460 = vsyncadd [#allocation6], 4294966272  ;;  %v379_v0 = vld [vmem:[#allocation5] sm:$0xff]   ;;  %v380_v1 = vld [vmem:[#allocation5 + $0x8] sm:$0xff]  }
  0x29   :  { %334 = vmatprep.subr.bf16.mxu0 %v379_v0  ;;  %358 = vmatprep.subr.bf16.mxu1 %v379_v0  ;;  %v381_v2 = vld [vmem:[#allocation5 + $0x10] sm:$0xff]   ;;  %v382_v3 = vld [vmem:[#allocation5 + $0x18] sm:$0xff]   ;;  %v387_v4 = vld [vmem:[#allocation2] sm:$0xff]  }
  0x2a   :  { %335 = vmatpush3.bf16.msra.mxu0 %v379_v0  ;;  %366 = vmatpush3.bf16.msra.mxu1 %v379_v0  ;;  %v388_v5 = vld [vmem:[#allocation2 + $0x10] sm:$0xff]   ;;  %v383_v6 = vld [vmem:[#allocation5 + $0x20] sm:$0xff]   ;;  %v384_v7 = vld [vmem:[#allocation5 + $0x28] sm:$0xff]  }
  0x2b   :  { %336 = vmatprep.subr.bf16.mxu0 %v380_v1  ;;  %359 = vmatprep.subr.bf16.mxu1 %v380_v1  ;;  %v385_v8 = vld [vmem:[#allocation5 + $0x30] sm:$0xff]   ;;  %v386_v9 = vld [vmem:[#allocation5 + $0x38] sm:$0xff]   ;;  %v389_v10 = vld [vmem:[#allocation2 + $0x8] sm:$0xff]  }
  0x2c   :  { %350 = vmatprep.mubr.bf16.mxu0 %v387_v4  ;;  %354 = vmatprep.mubr.bf16.mxu1 %v388_v5  ;;  %v390_v11 = vld [vmem:[#allocation2 + $0x18] sm:$0xff]   ;;  %v270_v13 = vld [vmem:[%s538_s2] ss:$0 sm:$0xff] }
  0x2e   :  { %337 = vmatpush3.bf16.msra.mxu0 %v380_v1  ;;  %367 = vmatpush3.bf16.msra.mxu1 %v380_v1 }
  0x2f   :  { %338 = vmatprep.subr.bf16.mxu0 %v381_v2  ;;  %360 = vmatprep.subr.bf16.mxu1 %v381_v2 }
  0x32   :  { %339 = vmatpush3.bf16.msra.mxu0 %v381_v2  ;;  %368 = vmatpush3.bf16.msra.mxu1 %v381_v2 }
  0x33   :  { %340 = vmatprep.subr.bf16.mxu0 %v382_v3  ;;  %361 = vmatprep.subr.bf16.mxu1 %v382_v3 }
  0x36   :  { %341 = vmatpush3.bf16.msra.mxu0 %v382_v3  ;;  %369 = vmatpush3.bf16.msra.mxu1 %v382_v3 }
  0x37   :  { %342 = vmatprep.subr.bf16.mxu0 %v383_v6  ;;  %362 = vmatprep.subr.bf16.mxu1 %v383_v6 }
  0x3a   :  { %343 = vmatpush3.bf16.msra.mxu0 %v383_v6  ;;  %370 = vmatpush3.bf16.msra.mxu1 %v383_v6 }
  0x3b   :  { %344 = vmatprep.subr.bf16.mxu0 %v384_v7  ;;  %363 = vmatprep.subr.bf16.mxu1 %v384_v7 }
  0x3e   :  { %345 = vmatpush3.bf16.msra.mxu0 %v384_v7  ;;  %371 = vmatpush3.bf16.msra.mxu1 %v384_v7 }
  0x3f   :  { %346 = vmatprep.subr.bf16.mxu0 %v385_v8  ;;  %364 = vmatprep.subr.bf16.mxu1 %v385_v8 }
  0x42   :  { %347 = vmatpush3.bf16.msra.mxu0 %v385_v8  ;;  %372 = vmatpush3.bf16.msra.mxu1 %v385_v8 }
  0x43   :  { %348 = vmatprep.subr.bf16.mxu0 %v386_v9  ;;  %365 = vmatprep.subr.bf16.mxu1 %v386_v9 }
  0x46   :  { %349 = vmatpush3.bf16.msra.mxu0 %v386_v9  ;;  %373 = vmatpush3.bf16.msra.mxu1 %v386_v9 }
  0x49   :  { %351 = vmatmul.mubr.bf16.vlgmr.msra.gmra.mrb[0].mxu0 %v389_v10  ;;  %355 = vmatmul.mubr.bf16.vlgmr.msra.gmra.mrb[0].mxu1 %v390_v11 }
 0x11c   :  { %v352_v12 = vpop.f32.mrb[0].mxu0  ;;  %v356_v14 = vpop.f32.mrb[0].mxu1 }
 0x11d   :  { %v181_v15 = vpop.f32.mrb[1].mxu0  ;;  %v197_v16 = vpop.f32.mrb[1].mxu1  ;;  %v190_v19 = vadd.f32 %v352_v12, %v270_v13  ;;  %v206_v20 = vadd.f32 %v356_v14, %v270_v13 }
 0x11e   :  { %v353_v17 = vpop.f32.mrb[2].mxu0  ;;  %v357_v18 = vpop.f32.mrb[2].mxu1  ;;  %v182_v25 = vadd.f32 %v270_v13, %v181_v15  ;;  %v198_v26 = vadd.f32 %v270_v13, %v197_v16 }
 0x11f   :  { %v193_v21 = vadd.f32 %v353_v17, %v270_v13  ;;  %v209_v22 = vadd.f32 %v357_v18, %v270_v13  ;;  %v184_v23 = vpop.f32.mrb[3].mxu0  ;;  %v200_v24 = vpop.f32.mrb[3].mxu1 }
 0x120   :  { %v185_v27 = vadd.f32 %v270_v13, %v184_v23  ;;  %v201_v28 = vadd.f32 %v270_v13, %v200_v24 }
 0x121   :  { %v307_v29 = vpack.c.bf16 %v193_v21, %v190_v19  ;;  %v317_v30 = vpack.c.bf16 %v209_v22, %v206_v20 }
 0x122   :  { %v302_v31 = vpack.c.bf16 %v185_v27, %v182_v25  ;;  %v312_v32 = vpack.c.bf16 %v201_v28, %v198_v26 }
 0x123   :  { %319 = vst [vmem:[#allocation7 + $0x8] sm:$0xff] %v307_v29   ;;  %321 = vst [vmem:[#allocation7 + $0x18] sm:$0xff] %v317_v30  }
 0x124   :  { %303 = vst [vmem:[#allocation7] sm:$0xff] %v302_v31   ;;  %320 = vst [vmem:[#allocation7 + $0x10] sm:$0xff] %v312_v32  }
 0x125   :  { %256 = vsyncadd [#allocation4], 64  ;;  %s467_s2 = smov [#allocation7]  }
 0x126   :  { %s257_s12 = sshll.u32 %s467_s2, 4  ;;  %s258_s12 = int_to_ptr.vmem [resolvable:$true] %s257_s12 }
 0x127   :  { %s435_s13 = scalar_lea.vmem %s258_s12, 448  ;;  %s439_s14 = scalar_lea.vmem %s258_s12, 512 }
 0x128   :  { %p436_p2 = scmp.ne.s32.totalorder %s258_s12, %s435_s13  ;;  %p440_p3 = scmp.lt.s32.totalorder %s258_s12, %s258_s12 }
 0x129   :  { %p441_p4 = scmp.lt.s32.totalorder %s439_s14, %s435_s13 }
 0x12b   :  { %p442_p5 = por %p441_p4, %p440_p3 }
 0x12d   :  { %p443_p6 = pnand %p442_p5, %p436_p2 }
 0x12f   :  { %446 = shalt.err (!%p443_p6)
}
 0x130   :  { %s447_s17 = scalar_lea.hbm %s539_s3, 448 }
 0x131   :  { %p448_p7 = scmp.ne.s32.totalorder %s539_s3, %s447_s17  ;;  %p451_p8 = scmp.lt.u32.totalorder %s447_s17, %s539_s3 }
 0x133   :  { %p453_p9 = pnand %p451_p8, %p448_p7 }
 0x135   :  { %456 = shalt.err (!%p453_p9)
}
 0x136   :  { %263 = dma.vmem_to_hbm [thread:$0]  %s258_s12, 448, %s539_s3, [#allocation4], %s464_s23, %s464_s23, %s465_s24  }
 0x137   :  { %461 = dma.done.wait [#allocation4], 512  }
 0x138   :  { %462 = vsyncadd [#allocation4], 4294966784 }
 0x139   :  { %267 = vsyncpa [#allocation3], 1 }
 0x13a   :  { %268 = vsyncpa [#allocation6], 1 }
 0x13b   :  { %269 = vsyncpa [#allocation4], 1 }

</bundles_post_ra>
